<compile_context>
chip_gen: v7x
topology: tpu7x:2x2x1
jax: 0.10.0
libtpu: 0.0.40
codegen_flags: <defaults>
</compile_context>

<pallas_src>
import functools

import jax
import jax.numpy as jnp
from jax.experimental import pallas as pl
from jax.experimental.pallas import tpu as pltpu

IN_FEATURES = 512
OUT_FEATURES = 2
OUT_PAD = 8  # out-features padded to one sublane group; real columns are [:2]


def _linear_sigmoid_kernel(x_ref, w_ref, b_ref, o_ref):
    # x_ref: (tb, 512) f32, w_ref: (512, 8) f32, b_ref: (1, 8) f32,
    # o_ref: (tb, 8) f32.  Everything stays f32 (memory-bound; MXU time hides
    # under the x-tile DMA), sigmoid runs on the EUP.
    z = jnp.dot(x_ref[...], w_ref[...], preferred_element_type=jnp.float32)
    z = z + b_ref[...]          # (tb, 8) + (1, 8) broadcast
    o_ref[...] = jax.nn.sigmoid(z)


def _round_up(x, m):
    return (x + m - 1) // m * m


@functools.partial(jax.jit, static_argnames=("tile_b",))
def net_forward(x, w, b, *, tile_b=4096):
    """sigmoid(x @ w + b).  x: [B, 512] f32, w: [512, 2] f32, b: [2] f32 -> [B, 2] f32."""
    B, K = x.shape
    K2, N = w.shape
    assert K == K2 == IN_FEATURES and N == OUT_FEATURES

    # Feed x directly (no cast, no copy).  Only pad the batch when it is not a
    # multiple of 8 (sublane granularity); a non-divisible grid is handled by
    # Pallas' ragged last block, whose out-of-range output rows are masked on
    # store and never read back.
    Bp = _round_up(B, 8)
    x_in = x if Bp == B else jnp.pad(x, ((0, Bp - B), (0, 0)))
    if x_in.dtype != jnp.float32:
        x_in = x_in.astype(jnp.float32)

    # Batch tile: big (amortizes ~0.35 us/step overhead), multiple of 8, never
    # larger than the (padded) batch so blocks never exceed the array.
    tb = min(_round_up(tile_b, 8), Bp)
    grid = pl.cdiv(Bp, tb)

    # Tiny padded parameters (16 KiB total) -- negligible to materialize.
    w_pad = jnp.zeros((K, OUT_PAD), dtype=jnp.float32).at[:, :N].set(
        w.astype(jnp.float32))
    b_row = jnp.zeros((1, OUT_PAD), dtype=jnp.float32).at[0, :N].set(
        b.astype(jnp.float32))

    out_padded = pl.pallas_call(
        _linear_sigmoid_kernel,
        out_shape=jax.ShapeDtypeStruct((Bp, OUT_PAD), jnp.float32),
        grid=(grid,),
        in_specs=[
            pl.BlockSpec((tb, K), lambda i: (i, 0)),        # streamed x tiles
            pl.BlockSpec((K, OUT_PAD), lambda i: (0, 0)),   # weights: fetched once
            pl.BlockSpec((1, OUT_PAD), lambda i: (0, 0)),   # bias: fetched once
        ],
        out_specs=pl.BlockSpec((tb, OUT_PAD), lambda i: (i, 0)),
        compiler_params=pltpu.CompilerParams(
            # Independent batch tiles -> shard across TensorCores on v7x.
            dimension_semantics=("parallel",),
            # Double-buffered f32 x tile (tb=4096 -> ~17 MiB) plus small
            # out/W buffers; 48 MiB leaves ~25% headroom on v7x (64 MiB VMEM)
            # and allows tile_b up to ~8192 after further output shrinking.
            vmem_limit_bytes=48 * 1024 * 1024,
        ),
    )(x_in, w_pad, b_row)

    # Drop batch padding (if any) and the 6 padded out-feature columns
    # (they hold sigmoid(0) = 0.5 and are never consumed).
    return out_padded[:B, :N]


if __name__ == "__main__":
    key = jax.random.PRNGKey(0)
    kx, kw, kb = jax.random.split(key, 3)

    B = 8
    x = jax.random.normal(kx, (B, IN_FEATURES), dtype=jnp.float32)

    # Deterministic parameter init mimicking nn.Linear default:
    # U(-1/sqrt(in_features), 1/sqrt(in_features)).  w is stored as
    # (in_features, out_features), i.e. the PyTorch weight transposed.
    bound = 1.0 / jnp.sqrt(jnp.float32(IN_FEATURES))
    w = jax.random.uniform(kw, (IN_FEATURES, OUT_FEATURES), dtype=jnp.float32,
                           minval=-bound, maxval=bound)
    b = jax.random.uniform(kb, (OUT_FEATURES,), dtype=jnp.float32,
                           minval=-bound, maxval=bound)

    out = net_forward(x, w, b)
    jax.block_until_ready(out)

    # Pure-JAX f32 reference.
    ref = jax.nn.sigmoid(x @ w + b[None, :])
    assert out.shape == (B, OUT_FEATURES)
    assert jnp.allclose(out, ref, atol=1e-2, rtol=1e-2), float(
        jnp.max(jnp.abs(out - ref)))
    print("KERNEL_OK")
</pallas_src>

<mosaic_0001>
module attributes {stable_mosaic.version = 11 : i64} {
  func.func @_linear_sigmoid_kernel(%arg0: i32, %arg1: memref<8x512xf32, #tpu.memory_space<vmem>>, %arg2: memref<512x8xf32, #tpu.memory_space<vmem>>, %arg3: memref<1x8xf32, #tpu.memory_space<vmem>>, %arg4: memref<8x8xf32, #tpu.memory_space<vmem>>) attributes {dimension_semantics = [#tpu.dimension_semantics<parallel>], iteration_bounds = array<i64: 1>, scalar_prefetch = 0 : i64, scratch_operands = 0 : i64, tpu.core_type = #tpu.core_type<tc>, window_params = [{transform_indices = @transform_0, window_bounds = array<i64: 8, 512>}, {pipeline_mode = #tpu.pipeline_mode<synchronous>, transform_indices = @transform_1, window_bounds = array<i64: 512, 8>}, {pipeline_mode = #tpu.pipeline_mode<synchronous>, transform_indices = @transform_2, window_bounds = array<i64: 1, 8>}, {transform_indices = @transform_3, window_bounds = array<i64: 8, 8>}]} {
    %c0 = arith.constant 0 : index
    %c0_0 = arith.constant 0 : index
    %0 = vector.load %arg1[%c0, %c0_0] : memref<8x512xf32, #tpu.memory_space<vmem>>, vector<8x512xf32>
    %c0_1 = arith.constant 0 : index
    %c0_2 = arith.constant 0 : index
    %1 = vector.load %arg2[%c0_1, %c0_2] : memref<512x8xf32, #tpu.memory_space<vmem>>, vector<512x8xf32>
    %cst = arith.constant dense<0.000000e+00> : vector<8x8xf32>
    %2 = tpu.matmul %0, %1, %cst {dimension_numbers = #tpu.dot_dimension_numbers<[1], [0], [0], [1], [0, 0, 1, 1], [], []>} : vector<8x512xf32>, vector<512x8xf32>, vector<8x8xf32> -> vector<8x8xf32>
    %c0_3 = arith.constant 0 : index
    %c0_4 = arith.constant 0 : index
    %3 = vector.load %arg3[%c0_3, %c0_4] : memref<1x8xf32, #tpu.memory_space<vmem>>, vector<1x8xf32>
    %4 = vector.broadcast %3 : vector<1x8xf32> to vector<8x8xf32>
    %5 = arith.addf %2, %4 : vector<8x8xf32>
    %6 = arith.negf %5 : vector<8x8xf32>
    %7 = math.exp %6 : vector<8x8xf32>
    %cst_5 = arith.constant 1.000000e+00 : f32
    %8 = vector.broadcast %cst_5 : f32 to vector<8x8xf32>
    %9 = arith.addf %8, %7 : vector<8x8xf32>
    %10 = arith.divf %8, %9 : vector<8x8xf32>
    %c0_6 = arith.constant 0 : index
    %c0_7 = arith.constant 0 : index
    %11 = vector.load %arg4[%c0_6, %c0_7] : memref<8x8xf32, #tpu.memory_space<vmem>>, vector<8x8xf32>
    tpu.vector_store %arg4[%c0_6, %c0_7], %10 {strides = array<i32>} : memref<8x8xf32, #tpu.memory_space<vmem>>, vector<8x8xf32>,
    return
  }
  func.func @transform_0(%arg0: i32) -> (i32, i32) {
    %c0_i32 = arith.constant 0 : i32
    %c0_i32_0 = arith.constant 0 : i32
    return %arg0, %c0_i32 : i32, i32
  }
  func.func @transform_1(%arg0: i32) -> (i32, i32) {
    %c0_i32 = arith.constant 0 : i32
    %c0_i32_0 = arith.constant 0 : i32
    %c0_i32_1 = arith.constant 0 : i32
    return %c0_i32, %c0_i32_0 : i32, i32
  }
  func.func @transform_2(%arg0: i32) -> (i32, i32) {
    %c0_i32 = arith.constant 0 : i32
    %c0_i32_0 = arith.constant 0 : i32
    %c0_i32_1 = arith.constant 0 : i32
    return %c0_i32, %c0_i32_0 : i32, i32
  }
  func.func @transform_3(%arg0: i32) -> (i32, i32) {
    %c0_i32 = arith.constant 0 : i32
    %c0_i32_0 = arith.constant 0 : i32
    return %arg0, %c0_i32 : i32, i32
  }
}

</mosaic_0001>

<bundles_post_ra>
// kernel: net_forward.1
= control target key start
LH: loop header
LB: loop body
LE: loop exit
PB: predicated region body
PF: predicated region fallthrough
CT: control target
= control target key end

     0   :  { %vm235_vm0 = vcmask 64512   ;;  %s611_s1 = inlined_call_operand.vmem [shape: f32[512,8], index: 1, kind: input, shape index: {}]   ;;  %s612_s0 = inlined_call_operand.vmem [shape: f32[8,512], index: 0, kind: input, shape index: {}]   ;;  %s613_s2 = inlined_call_operand.vmem [shape: f32[1,8], index: 2, kind: input, shape index: {}]   ;;  %s614_s3 = inlined_call_operand.vmem [shape: f32[8,8], index: 3, kind: output, shape index: {}]  }
   0x1   :  { %v34_v0 = vld [vmem:[%s611_s1 + $0x80] sm:$0xff]  ;;  %v35_v1 = vld [vmem:[%s611_s1 + $0x88] sm:$0xff]  ;;  %v36_v11 = vld [vmem:[%s611_s1 + $0x90] sm:$0xff] }
   0x2   :  { %v18_v2 = vld [vmem:[%s611_s1] sm:$0xff]  ;;  %v313_v3 = vpack.c.bf16 %v35_v1, %v34_v0  ;;  %v19_v4 = vld [vmem:[%s611_s1 + $0x8] sm:$0xff]  ;;  %v37_v13 = vld [vmem:[%s611_s1 + $0x98] sm:$0xff] }
   0x3   :  { %v66_v5 = vld [vmem:[%s611_s1 + $0x180] sm:$0xff]  ;;  %v67_v6 = vld [vmem:[%s611_s1 + $0x188] sm:$0xff]  ;;  %v315_v7 = vpack.c.bf16 %v19_v4, %v18_v2  ;;  %v20_v14 = vld [vmem:[%s611_s1 + $0x10] sm:$0xff]  ;;  %v317_v16 = vpack.c.bf16 %v37_v13, %v36_v11 }
   0x4   :  { %v345_v8 = vpack.c.bf16 %v67_v6, %v66_v5  ;;  %v50_v9 = vld [vmem:[%s611_s1 + $0x100] sm:$0xff]  ;;  %v51_v10 = vld [vmem:[%s611_s1 + $0x108] sm:$0xff]  ;;  %314 = vmatprep.subr.bf16.mxu0 %v313_v3  ;;  %v21_v15 = vld [vmem:[%s611_s1 + $0x18] sm:$0xff] }
   0x5   :  { %v347_v12 = vpack.c.bf16 %v51_v10, %v50_v9  ;;  %316 = vmatpush3.bf16.msra.mxu0 %v315_v7  ;;  %v319_v17 = vpack.c.bf16 %v21_v15, %v20_v14  ;;  %v68_v18 = vld [vmem:[%s611_s1 + $0x190] sm:$0xff]  ;;  %v69_v19 = vld [vmem:[%s611_s1 + $0x198] sm:$0xff]  ;;  %v38_v23 = vld [vmem:[%s611_s1 + $0xa0] sm:$0xff] }
   0x6   :  { %346 = vmatprep.subr.bf16.mxu1 %v345_v8  ;;  %v52_v20 = vld [vmem:[%s611_s1 + $0x110] sm:$0xff]  ;;  %v349_v21 = vpack.c.bf16 %v69_v19, %v68_v18  ;;  %v53_v22 = vld [vmem:[%s611_s1 + $0x118] sm:$0xff]  ;;  %v39_v24 = vld [vmem:[%s611_s1 + $0xa8] sm:$0xff]  ;;  %318 = vmatprep.subr.bf16.mxu0 %v317_v16 }
   0x7   :  { %348 = vmatpush3.bf16.msra.mxu1 %v347_v12  ;;  %v351_v25 = vpack.c.bf16 %v53_v22, %v52_v20  ;;  %v321_v26 = vpack.c.bf16 %v39_v24, %v38_v23  ;;  %v22_v27 = vld [vmem:[%s611_s1 + $0x20] sm:$0xff]  ;;  %v23_v28 = vld [vmem:[%s611_s1 + $0x28] sm:$0xff]  ;;  %v40_v35 = vld [vmem:[%s611_s1 + $0xb0] sm:$0xff] }
   0x8   :  { %v70_v29 = vld [vmem:[%s611_s1 + $0x1a0] sm:$0xff]  ;;  %350 = vmatprep.subr.bf16.mxu1 %v349_v21  ;;  %v71_v30 = vld [vmem:[%s611_s1 + $0x1a8] sm:$0xff]  ;;  %v323_v33 = vpack.c.bf16 %v23_v28, %v22_v27  ;;  %v41_v36 = vld [vmem:[%s611_s1 + $0xb8] sm:$0xff] }
   0x9   :  { %v54_v31 = vld [vmem:[%s611_s1 + $0x120] sm:$0xff]  ;;  %v55_v32 = vld [vmem:[%s611_s1 + $0x128] sm:$0xff]  ;;  %320 = vmatpush3.bf16.msra.mxu0 %v319_v17  ;;  %v353_v34 = vpack.c.bf16 %v71_v30, %v70_v29  ;;  %v24_v37 = vld [vmem:[%s611_s1 + $0x30] sm:$0xff]  ;;  %v325_v39 = vpack.c.bf16 %v41_v36, %v40_v35 }
   0xa   :  { %322 = vmatprep.subr.bf16.mxu0 %v321_v26  ;;  %v355_v38 = vpack.c.bf16 %v55_v32, %v54_v31  ;;  %v25_v40 = vld [vmem:[%s611_s1 + $0x38] sm:$0xff]  ;;  %v72_v41 = vld [vmem:[%s611_s1 + $0x1b0] sm:$0xff]  ;;  %v42_v46 = vld [vmem:[%s611_s1 + $0xc0] sm:$0xff] }
   0xb   :  { %352 = vmatpush3.bf16.msra.mxu1 %v351_v25  ;;  %v73_v42 = vld [vmem:[%s611_s1 + $0x1b8] sm:$0xff]  ;;  %v56_v44 = vld [vmem:[%s611_s1 + $0x130] sm:$0xff]  ;;  %v43_v47 = vld [vmem:[%s611_s1 + $0xc8] sm:$0xff]  ;;  %v327_v48 = vpack.c.bf16 %v25_v40, %v24_v37 }
   0xc   :  { %354 = vmatprep.subr.bf16.mxu1 %v353_v34  ;;  %v357_v43 = vpack.c.bf16 %v73_v42, %v72_v41  ;;  %v57_v45 = vld [vmem:[%s611_s1 + $0x138] sm:$0xff]  ;;  %v74_v49 = vld [vmem:[%s611_s1 + $0x1c0] sm:$0xff]  ;;  %v75_v50 = vld [vmem:[%s611_s1 + $0x1c8] sm:$0xff]  ;;  %v329_v52 = vpack.c.bf16 %v43_v47, %v42_v46 }
   0xd   :  { %324 = vmatpush3.bf16.msra.mxu0 %v323_v33  ;;  %v359_v51 = vpack.c.bf16 %v57_v45, %v56_v44  ;;  %v26_v53 = vld [vmem:[%s611_s1 + $0x40] sm:$0xff]  ;;  %v27_v54 = vld [vmem:[%s611_s1 + $0x48] sm:$0xff]  ;;  %v361_v56 = vpack.c.bf16 %v75_v50, %v74_v49  ;;  %v44_v58 = vld [vmem:[%s611_s1 + $0xd0] sm:$0xff] }
   0xe   :  { %326 = vmatprep.subr.bf16.mxu0 %v325_v39  ;;  %v58_v55 = vld [vmem:[%s611_s1 + $0x140] sm:$0xff]  ;;  %v59_v57 = vld [vmem:[%s611_s1 + $0x148] sm:$0xff]  ;;  %v45_v59 = vld [vmem:[%s611_s1 + $0xd8] sm:$0xff]  ;;  %v331_v62 = vpack.c.bf16 %v27_v54, %v26_v53 }
   0xf   :  { %356 = vmatpush3.bf16.msra.mxu1 %v355_v38  ;;  %v76_v60 = vld [vmem:[%s611_s1 + $0x1d0] sm:$0xff]  ;;  %v77_v61 = vld [vmem:[%s611_s1 + $0x1d8] sm:$0xff]  ;;  %v363_v63 = vpack.c.bf16 %v59_v57, %v58_v55  ;;  %v333_v0 = vpack.c.bf16 %v45_v59, %v44_v58  ;;  %v46_v6 = vld [vmem:[%s611_s1 + $0xe0] sm:$0xff] }
  0x10   :  { %358 = vmatprep.subr.bf16.mxu1 %v357_v43  ;;  %v28_v1 = vld [vmem:[%s611_s1 + $0x50] sm:$0xff]  ;;  %v29_v2 = vld [vmem:[%s611_s1 + $0x58] sm:$0xff]  ;;  %v365_v4 = vpack.c.bf16 %v77_v61, %v76_v60  ;;  %v47_v7 = vld [vmem:[%s611_s1 + $0xe8] sm:$0xff] }
  0x11   :  { %328 = vmatpush3.bf16.msra.mxu0 %v327_v48  ;;  %v60_v3 = vld [vmem:[%s611_s1 + $0x150] sm:$0xff]  ;;  %v61_v5 = vld [vmem:[%s611_s1 + $0x158] sm:$0xff]  ;;  %v78_v8 = vld [vmem:[%s611_s1 + $0x1e0] sm:$0xff]  ;;  %v335_v10 = vpack.c.bf16 %v29_v2, %v28_v1  ;;  %v337_v14 = vpack.c.bf16 %v47_v7, %v46_v6 }
  0x12   :  { %330 = vmatprep.subr.bf16.mxu0 %v329_v52  ;;  %v79_v9 = vld [vmem:[%s611_s1 + $0x1e8] sm:$0xff]  ;;  %v30_v11 = vld [vmem:[%s611_s1 + $0x60] sm:$0xff]  ;;  %v367_v13 = vpack.c.bf16 %v61_v5, %v60_v3  ;;  %v48_v19 = vld [vmem:[%s611_s1 + $0xf0] sm:$0xff] }
  0x13   :  { %360 = vmatpush3.bf16.msra.mxu1 %v359_v51  ;;  %v31_v12 = vld [vmem:[%s611_s1 + $0x68] sm:$0xff]  ;;  %v62_v15 = vld [vmem:[%s611_s1 + $0x160] sm:$0xff]  ;;  %v369_v18 = vpack.c.bf16 %v79_v9, %v78_v8  ;;  %v49_v20 = vld [vmem:[%s611_s1 + $0xf8] sm:$0xff] }
  0x14   :  { %362 = vmatprep.subr.bf16.mxu1 %v361_v56  ;;  %v63_v16 = vld [vmem:[%s611_s1 + $0x168] sm:$0xff]  ;;  %v17_v21 = vld [vmem:[%s612_s0 + $0x18] sm:$0xff]  ;;  %v80_v22 = vld [vmem:[%s611_s1 + $0x1f0] sm:$0xff]  ;;  %v339_v24 = vpack.c.bf16 %v31_v12, %v30_v11  ;;  %v341_v26 = vpack.c.bf16 %v49_v20, %v48_v19 }
  0x15   :  { %332 = vmatpush3.bf16.msra.mxu0 %v331_v62  ;;  %v15_v17 = vld [vmem:[%s612_s0 + $0x8] sm:$0xff]  ;;  %v81_v23 = vld [vmem:[%s611_s1 + $0x1f8] sm:$0xff]  ;;  %223 = vmatprep.mubr.f32.mxu1 %v17_v21  ;;  %v371_v25 = vpack.c.bf16 %v63_v16, %v62_v15  ;;  %v32_v27 = vld [vmem:[%s611_s1 + $0x70] sm:$0xff] }
  0x16   :  { %334 = vmatprep.subr.bf16.mxu0 %v333_v0  ;;  %153 = vmatprep.mubr.f32.mxu0 %v15_v17  ;;  %v33_v28 = vld [vmem:[%s611_s1 + $0x78] sm:$0xff]  ;;  %v373_v29 = vpack.c.bf16 %v81_v23, %v80_v22  ;;  %v64_v30 = vld [vmem:[%s611_s1 + $0x170] sm:$0xff]  ;;  %v14_v34 = vld [vmem:[%s612_s0] sm:$0xff] }
  0x17   :  { %364 = vmatpush3.bf16.msra.mxu1 %v363_v63  ;;  %v65_v31 = vld [vmem:[%s611_s1 + $0x178] sm:$0xff]  ;;  %v343_v32 = vpack.c.bf16 %v33_v28, %v32_v27  ;;  %v16_v35 = vld [vmem:[%s612_s0 + $0x10] sm:$0xff]  ;;  %v241_v37 = vld [vmem:[%s613_s2] ss:$0 sm:$0xff] }
  0x18   :  { %366 = vmatprep.subr.bf16.mxu1 %v365_v4  ;;  %v375_v33 = vpack.c.bf16 %v65_v31, %v64_v30 }
  0x19   :  { %336 = vmatpush3.bf16.msra.mxu0 %v335_v10 }
  0x1a   :  { %338 = vmatprep.subr.bf16.mxu0 %v337_v14 }
  0x1b   :  { %368 = vmatpush3.bf16.msra.mxu1 %v367_v13 }
  0x1c   :  { %370 = vmatprep.subr.bf16.mxu1 %v369_v18 }
  0x1d   :  { %340 = vmatpush3.bf16.msra.mxu0 %v339_v24 }
  0x1e   :  { %342 = vmatprep.subr.bf16.mxu0 %v341_v26 }
  0x1f   :  { %372 = vmatpush3.bf16.msra.mxu1 %v371_v25 }
  0x20   :  { %374 = vmatprep.subr.bf16.mxu1 %v373_v29 }
  0x21   :  { %344 = vmatpush3.bf16.msra.mxu0 %v343_v32 }
  0x23   :  { %376 = vmatpush3.bf16.msra.mxu1 %v375_v33 }
  0x24   :  { %154 = vmatmul.mubr.f32.vlgmr.msra.gmra.mrb[0].mxu0 %v14_v34 }
  0x26   :  { %224 = vmatmul.mubr.f32.vlgmr.msra.gmra.mrb[0].mxu1 %v16_v35 }
  0xf7   :  { %v275_v36 = vpop.f32.mrb[0].mxu0 }
  0xf8   :  { %v276_v38 = vpop.f32.mrb[1].mxu0 }
  0xf9   :  { %v310_v39 = vpop.f32.mrb[0].mxu1  ;;  %v277_v40 = vadd.f32 %v276_v38, %v275_v36 }
  0xfa   :  { %v311_v41 = vpop.f32.mrb[1].mxu1 }
  0xfb   :  { %v312_v42 = vadd.f32 %v311_v41, %v310_v39  ;;  %v156_v43 = vadd.f32 %v277_v40, %v241_v37 }
  0xfd   :  { %v226_v44 = vadd.f32 %v312_v42, %v156_v43 }
  0xff   :  { %v242_v45 = vmul.f32 -1.442695, %v226_v44 }
 0x101   :  { %377 = vpow2.f32 %v242_v45 }
 0x10b   :  { %v378_v46 = vpop.eup %377 }
 0x10c   :  { %v232_v47 = vadd.f32 1.0, %v378_v46 }
 0x10e   :  { %379 = vrcp.f32 %v232_v47 }
 0x118   :  { %v380_v48 = vpop.eup %379 }
 0x119   :  { %236 = vst.msk [vmem:[%s614_s3] sm:$0xff] %vm235_vm0, %v380_v48 }

</bundles_post_ra>
